<compile_context>
chip_gen: v6e
topology: v6e:2x2x1
jax: 0.10.0
libtpu: 0.0.40
codegen_flags: <defaults>
</compile_context>

<pallas_src>
import functools
import math

import jax
import jax.numpy as jnp
from jax import lax
from jax.experimental import pallas as pl
from jax.experimental.pallas import tpu as pltpu


_MIB = 1 << 20
_VMEM_CAP = 64 * _MIB        # never request more than v7x physical VMEM
_VMEM_FLOOR = 32 * _MIB      # never request less than the v6e/v7x default
_WEIGHT_BUDGET = 24 * _MIB   # budget for the (double-buffered) weight tile
_STREAM_BUDGET = 40 * _MIB   # budget for the double-buffered row streams
_BLOCK_TARGET = 2 * _MIB     # ~2 MiB per ref per buffer (85%+ HBM roofline)


def _round_up(x, m):
    return (x + m - 1) // m * m


def _min_sublane(dtype):
    """Minimum second-to-last tile dim: 8 (32-bit), 16 (16-bit), 32 (8-bit)."""
    bits = jnp.dtype(dtype).itemsize * 8
    return max(8, 256 // max(bits, 1))


def _vmem_limit(estimate_bytes):
    return int(min(_VMEM_CAP, max(_VMEM_FLOOR, estimate_bytes + 4 * _MIB)))


def _pick_row_tile(rows, row_bytes, sublane, budget_bytes):
    """Row-tile size: multiple of `sublane` (or == rows), under a byte budget,
    split into >= 2 tiles when possible so v7x's 2 TensorCores both work."""
    br = (budget_bytes // max(row_bytes, 1)) // sublane * sublane
    br = max(sublane, br)
    if rows <= br:
        if rows >= 2 * sublane:
            return _round_up((rows + 1) // 2, sublane)
        return rows                      # tiny: single full-extent block
    return br


# ---------------------------------------------------------------------------
# Kernels
# ---------------------------------------------------------------------------
def _skip_add_kernel(in_ref, outx_ref, o_ref):
    """in_dim == out_dim path: lane-dense elementwise residual add."""
    o_ref[...] = (in_ref[...] + outx_ref[...]).astype(o_ref.dtype)


def _skip_proj_kernel(in_ref, outx_ref, w_ref, o_ref):
    """in_dim != out_dim path: out = in_x @ W^T + out_x, fused in one tile.

    in_ref: (tm, in_dim); w_ref: (tn, in_dim) in PyTorch nn.Linear layout.
    Contract the last dims directly so the wrapper never materializes a
    transposed copy of W in HBM.
    """
    proj = lax.dot_general(in_ref[...], w_ref[...],
                           dimension_numbers=(((1,), (1,)), ((), ())),
                           preferred_element_type=jnp.float32)
    o_ref[...] = (proj + outx_ref[...].astype(jnp.float32)).astype(o_ref.dtype)


# ---------------------------------------------------------------------------
# Wrapper
# ---------------------------------------------------------------------------
@functools.partial(jax.jit, static_argnames=("tm",))
def skip_connection(in_x, out_x, w_lin=None, *, tm=512):
    """SkipConnection forward.

    in_x : (..., in_dim)
    out_x: (..., out_dim)
    w_lin: (out_dim, in_dim) PyTorch nn.Linear layout, required iff
           in_dim != out_dim.  Returns (..., out_dim).
    """
    in_dim = in_x.shape[-1]
    out_dim = out_x.shape[-1]
    lead = out_x.shape[:-1]
    M = math.prod(lead) if lead else 1

    if in_dim == out_dim:
        out_dtype = jnp.promote_types(in_x.dtype, out_x.dtype)
    else:
        assert w_lin is not None, "w_lin required when in_dim != out_dim"
        w = jnp.asarray(w_lin)
        assert w.shape == (out_dim, in_dim)
        out_dtype = jnp.promote_types(jnp.promote_types(in_x.dtype, w.dtype),
                                      out_x.dtype)

    if M == 0:
        return jnp.zeros(lead + (out_dim,), out_dtype)

    # ------------------------------------------------------------------ #
    # Identity path: plain residual add, lane-dense layout, no copies.    #
    # ------------------------------------------------------------------ #
    if in_dim == out_dim:
        total = M * out_dim
        sub = max(_min_sublane(in_x.dtype), _min_sublane(out_x.dtype),
                  _min_sublane(out_dtype))
        elem_bytes = (in_x.dtype.itemsize + out_x.dtype.itemsize
                      + jnp.dtype(out_dtype).itemsize)

        # Lane-dense 2-D view chosen without any padding copies:
        #  * natural (M, out_dim) when out_dim is a multiple of 128,
        #  * free flatten to (total/128, 128) when only the total divides 128,
        #  * else natural view with full-extent lane dim (masked stores, but
        #    still zero extra HBM passes).
        if out_dim % 128 == 0 or total % 128 != 0:
            rows, width = M, out_dim
        else:
            rows, width = total // 128, 128
        a2d = in_x.reshape(rows, width)
        b2d = out_x.reshape(rows, width)

        br = _pick_row_tile(rows, width * elem_bytes, sub, 3 * _BLOCK_TARGET)
        spec = pl.BlockSpec((br, width), lambda i: (i, 0))
        est = 2 * br * width * elem_bytes  # 3 refs, double-buffered

        res = pl.pallas_call(
            _skip_add_kernel,
            out_shape=jax.ShapeDtypeStruct((rows, width), out_dtype),
            grid_spec=pltpu.PrefetchScalarGridSpec(
                num_scalar_prefetch=0,
                grid=(pl.cdiv(rows, br),),
                in_specs=[spec, spec],
                out_specs=spec,
            ),
            compiler_params=pltpu.CompilerParams(
                dimension_semantics=("parallel",),
                vmem_limit_bytes=_vmem_limit(est)),
        )(a2d, b2d)
        return res.reshape(*lead, out_dim)

    # ------------------------------------------------------------------ #
    # Projection path: in_x @ W^T + out_x, fused per (row, out-col) tile. #
    # ------------------------------------------------------------------ #
    in2d = in_x.reshape(M, in_dim)
    out2d = out_x.reshape(M, out_dim)

    sub = max(_min_sublane(in_x.dtype), _min_sublane(out_x.dtype),
              _min_sublane(out_dtype))
    in_isz = in_x.dtype.itemsize
    ox_isz = out_x.dtype.itemsize
    o_isz = jnp.dtype(out_dtype).itemsize
    w_isz = w.dtype.itemsize

    # N (out_dim) tiling only when the full weight blows the VMEM budget; tn
    # multiples of 256 keep the v6e/v7x MXU full-width.
    if 2 * out_dim * in_dim * w_isz <= _WEIGHT_BUDGET or out_dim <= 256:
        tn = out_dim
    else:
        tn = (_WEIGHT_BUDGET // (2 * in_dim * w_isz)) // 256 * 256
        tn = int(min(max(256, tn), out_dim))
        # TODO(synk): very large in_dim would additionally need K tiling with
        # an f32 VMEM scratch accumulator and an "arbitrary" K grid axis.
    grid_n = pl.cdiv(out_dim, tn)

    # M (row) tiling: big tiles, budgeted against scoped VMEM (double buffers).
    per_row = 2 * (in_dim * in_isz + tn * (ox_isz + o_isz))
    tm_req = max(sub, _round_up(min(tm, 1 << 16), sub))
    tm_eff = min(tm_req, max(sub, (_STREAM_BUDGET // per_row) // sub * sub))
    if M <= tm_eff:
        if M >= 2 * sub:
            tm_eff = _round_up((M + 1) // 2, sub)   # >=2 tiles for v7x's 2 TCs
        else:
            tm_eff = M                              # tiny: full-extent block
    grid_m = pl.cdiv(M, tm_eff)

    est = 2 * tn * in_dim * w_isz + tm_eff * per_row

    res = pl.pallas_call(
        _skip_proj_kernel,
        out_shape=jax.ShapeDtypeStruct((M, out_dim), out_dtype),
        grid_spec=pltpu.PrefetchScalarGridSpec(
            num_scalar_prefetch=0,
            grid=(grid_m, grid_n),
            in_specs=[
                pl.BlockSpec((tm_eff, in_dim), lambda i, j: (i, 0)),
                pl.BlockSpec((tm_eff, tn), lambda i, j: (i, j)),
                # Grid-invariant along rows (fully constant when grid_n == 1):
                # the weight DMA is hoisted out of the row loop.
                pl.BlockSpec((tn, in_dim), lambda i, j: (j, 0)),
            ],
            out_specs=pl.BlockSpec((tm_eff, tn), lambda i, j: (i, j)),
        ),
        compiler_params=pltpu.CompilerParams(
            dimension_semantics=("parallel", "parallel"),
            vmem_limit_bytes=_vmem_limit(est)),
    )(in2d, out2d, w)

    return res.reshape(*lead, out_dim)


# ---------------------------------------------------------------------------
# Reference + test
# ---------------------------------------------------------------------------
def _reference(in_x, out_x, w_lin=None):
    if in_x.shape[-1] != out_x.shape[-1]:
        in_x = in_x @ jnp.asarray(w_lin).T
    return in_x + out_x


if __name__ == "__main__":
    key = jax.random.PRNGKey(0)
    k0, k1, k2, k3, k4, k5, k6, k7 = jax.random.split(key, 8)

    B, N = 2, 8                 # batch, nodes -> 16 rows
    in_dim, out_dim = 16, 32

    in_x = jax.random.normal(k0, (B, N, in_dim), jnp.float32)
    out_x = jax.random.normal(k1, (B, N, out_dim), jnp.float32)
    # PyTorch nn.Linear layout: (out_features, in_features), bias-free.
    w_lin = 0.1 * jax.random.normal(k2, (out_dim, in_dim), jnp.float32)

    # 1) Projection path (in_dim != out_dim): fused matmul + residual.
    got = skip_connection(in_x, out_x, w_lin)
    jax.block_until_ready(got)
    ref = _reference(in_x, out_x, w_lin)
    assert got.shape == (B, N, out_dim)
    assert jnp.allclose(got, ref, atol=1e-5, rtol=1e-5), "proj path mismatch"

    # 2) Identity path (in_dim == out_dim), lane-unfriendly out_dim (flatten).
    in_x2 = jax.random.normal(k3, (B, N, out_dim), jnp.float32)
    got2 = skip_connection(in_x2, out_x)
    jax.block_until_ready(got2)
    assert jnp.allclose(got2, _reference(in_x2, out_x),
                        atol=1e-6, rtol=1e-6), "identity (flatten) mismatch"

    # 3) Identity path with out_dim % 128 == 0 (natural lane-dense view).
    a128 = jax.random.normal(k4, (B, N, 128), jnp.float32)
    b128 = jax.random.normal(k5, (B, N, 128), jnp.float32)
    got3 = skip_connection(a128, b128)
    jax.block_until_ready(got3)
    assert jnp.allclose(got3, _reference(a128, b128),
                        atol=1e-6, rtol=1e-6), "identity (natural) mismatch"

    # 4) Ragged row count (21 rows): no wrapper-side pad/slice copies.
    in_x4 = jax.random.normal(k6, (3, 7, in_dim), jnp.float32)
    out_x4 = jax.random.normal(k7, (3, 7, out_dim), jnp.float32)
    got4 = skip_connection(in_x4, out_x4, w_lin)
    jax.block_until_ready(got4)
    assert jnp.allclose(got4, _reference(in_x4, out_x4, w_lin),
                        atol=1e-5, rtol=1e-5), "ragged proj mismatch"

    print("KERNEL_OK")
</pallas_src>

<mosaic_0001>
module attributes {stable_mosaic.version = 11 : i64} {
  func.func @_skip_proj_kernel(%arg0: i32, %arg1: i32, %arg2: memref<8x16xf32, #tpu.memory_space<vmem>>, %arg3: memref<8x32xf32, #tpu.memory_space<vmem>>, %arg4: memref<32x16xf32, #tpu.memory_space<vmem>>, %arg5: memref<8x32xf32, #tpu.memory_space<vmem>>) attributes {dimension_semantics = [#tpu.dimension_semantics<parallel>, #tpu.dimension_semantics<parallel>], iteration_bounds = array<i64: 2, 1>, scalar_prefetch = 0 : i64, scratch_operands = 0 : i64, tpu.core_type = #tpu.core_type<tc>, window_params = [{transform_indices = @transform_0, window_bounds = array<i64: 8, 16>}, {transform_indices = @transform_1, window_bounds = array<i64: 8, 32>}, {transform_indices = @transform_2, window_bounds = array<i64: 32, 16>}, {transform_indices = @transform_3, window_bounds = array<i64: 8, 32>}]} {
    %c0 = arith.constant 0 : index
    %c0_0 = arith.constant 0 : index
    %0 = vector.load %arg2[%c0, %c0_0] : memref<8x16xf32, #tpu.memory_space<vmem>>, vector<8x16xf32>
    %c0_1 = arith.constant 0 : index
    %c0_2 = arith.constant 0 : index
    %1 = vector.load %arg4[%c0_1, %c0_2] : memref<32x16xf32, #tpu.memory_space<vmem>>, vector<32x16xf32>
    %cst = arith.constant dense<0.000000e+00> : vector<8x32xf32>
    %2 = tpu.matmul %0, %1, %cst {dimension_numbers = #tpu.dot_dimension_numbers<[1], [1], [0], [0], [0, 0, 1, 0], [], []>} : vector<8x16xf32>, vector<32x16xf32>, vector<8x32xf32> -> vector<8x32xf32>
    %c0_3 = arith.constant 0 : index
    %c0_4 = arith.constant 0 : index
    %3 = vector.load %arg3[%c0_3, %c0_4] : memref<8x32xf32, #tpu.memory_space<vmem>>, vector<8x32xf32>
    %4 = arith.addf %2, %3 : vector<8x32xf32>
    %c0_5 = arith.constant 0 : index
    %c0_6 = arith.constant 0 : index
    %5 = vector.load %arg5[%c0_5, %c0_6] : memref<8x32xf32, #tpu.memory_space<vmem>>, vector<8x32xf32>
    tpu.vector_store %arg5[%c0_5, %c0_6], %4 {strides = array<i32>} : memref<8x32xf32, #tpu.memory_space<vmem>>, vector<8x32xf32>,
    return
  }
  func.func @transform_0(%arg0: i32, %arg1: i32) -> (i32, i32) {
    %c0_i32 = arith.constant 0 : i32
    %c0_i32_0 = arith.constant 0 : i32
    return %arg0, %c0_i32 : i32, i32
  }
  func.func @transform_1(%arg0: i32, %arg1: i32) -> (i32, i32) {
    %c0_i32 = arith.constant 0 : i32
    return %arg0, %arg1 : i32, i32
  }
  func.func @transform_2(%arg0: i32, %arg1: i32) -> (i32, i32) {
    %c0_i32 = arith.constant 0 : i32
    %c0_i32_0 = arith.constant 0 : i32
    return %arg1, %c0_i32 : i32, i32
  }
  func.func @transform_3(%arg0: i32, %arg1: i32) -> (i32, i32) {
    %c0_i32 = arith.constant 0 : i32
    return %arg0, %arg1 : i32, i32
  }
}

</mosaic_0001>

<bundles_post_ra>
// kernel: skip_connection.1
= control target key start
LH: loop header
LB: loop body
LE: loop exit
PB: predicated region body
PF: predicated region fallthrough
CT: control target
= control target key end

     0   :  { %8 = vsyncpa [#allocation3], 0  ;;  %s754_s0 = inlined_call_operand.vmem [shape: f32[16,16], index: 0, kind: input, shape index: {}]   ;;  %s755_s1 = inlined_call_operand.vmem [shape: f32[16,32], index: 1, kind: input, shape index: {}]   ;;  %s756_s2 = inlined_call_operand.vmem [shape: f32[32,16], index: 2, kind: input, shape index: {}]   ;;  %s757_s3 = inlined_call_operand.hbm [shape: f32[16,32], index: 3, kind: output, shape index: {}]  }
   0x1   :  { %10 = vsyncpa [#allocation3 + $0x1], 0  ;;  %s629_s12 = smov 0   ;;  %s631_s13 = smov 0  }
   0x2   :  { %s633_s14 = smov 0   ;;  %s635_s15 = smov 0  }
   0x3   :  { %s637_s16 = smov 0   ;;  %s639_s17 = smov 0  }
   0x4 LB: > { %s437_s18 = sadd.s32 4294967295, %s604_s17   ;;  %s438_s19 = sadd.s32 4294967294, %s604_s17   ;;  %s604_s17 = sphi %s639_s17, %s16_s17   ;;  %s600_s16 = sphi %s637_s16, %s764_s16   ;;  %s596_s15 = sphi %s635_s15, %s763_s15   ;;  %s592_s14 = sphi %s633_s14, %s762_s14   ;;  %s588_s13 = sphi %s631_s13, %s761_s13   ;;  %s584_s12 = sphi %s629_s12, %s760_s12  }
   0x5   : > { %s28_s20 = sadd.s32 1, %s600_s16  ;;  %s117_s21 = sadd.s32 1, %s592_s14 }
   0x6   : > { %p30_p0 = scmp.ge.s32.totalorder %s28_s20, 2  ;;  %p127_p1 = scmp.ne.s32.totalorder %s592_s14, %s588_s13 }
   0x7   : > { %p128_p2 = scmp.eq.s32.totalorder %s437_s18, 1  ;;  %p133_p3 = scmp.ne.s32.totalorder %s588_s13, %s584_s12 }
   0x8   : > { %s766_s20 = smov (%p30_p0, %s28_s20), 0  ;;  %p134_p5 = scmp.eq.s32.totalorder %s438_s19, 1 }
   0x9   : > { %p669_p4 = por %p128_p2, %p127_p1  ;;  %s112_s23 = ssub.s32 %s600_s16, %s766_s20 }
   0xa   : > { %p442_p6 = scmp.ge.s32.totalorder %s604_s17, 1  ;;  %p115_p7 = scmp.eq.s32.totalorder %s112_s23, 0 }
   0xb   : > { %p676_p8 = por %p134_p5, %p133_p3  ;;  %p178_p9 = scmp.lt.s32.totalorder %s604_s17, 3 }
   0xc   : > { %s682_s25 = scalar_select %p115_p7, %s592_s14, %s117_s21  }
   0xd   : > { %p179_p10 = pnand %p442_p6, %p178_p9 }
   0xe   : > { %p213_p11 = scmp.lt.s32.totalorder (!%p179_p10), %s596_s15, 1  ;;  %s210_s18 = sand.u32 (!%p179_p10), 1, %s588_s13  }
   0xf   : > { %182 = sbr.rel (%p179_p10) target bundleno = 245 (0xf5), region = 32  ;;  %s443_s19 = sshll.u32 (!%p179_p10), %s210_s18, 3 }
  0x10   : > { %s452_s27 = sshll.u32 (!%p179_p10), %s596_s15, 7  ;;  %s212_s28 = scalar_lea.vmem (!%p179_p10), [#allocation2], %s443_s19 }
  0x11   : > { %s339_s29 = sshll.u32 (!%p179_p10), %s212_s28, 4  ;;  %s714_s5 = scalar_lea.hbm (!%p179_p10), %s757_s3, %s452_s27  ;;  %s340_s29 = int_to_ptr.vmem [resolvable:$true] %s339_s29 }
  0x12   : > { %s325_s7 = scalar_lea.sflag (!%p179_p10), [#allocation3], %s210_s18  ;;  %s528_s8 = scalar_lea.vmem (!%p179_p10), %s340_s29, 128 }
  0x13   : > { %p529_p12 = scmp.ne.s32.totalorder (!%p179_p10), %s340_s29, %s528_s8 }
  0x14   : > { %v234_v0 = vld [vmem:[%s756_s2 + $0x18] sm:$0xff]  ;;  %vm236_vm0 = vcmask 130048   ;;  %v606_v1 = vmov 0.0   ;;  %vm607_vm1 = vmmov 0   ;;  %v233_v2 = vld [vmem:[%s756_s2 + $0x10] sm:$0xff]  ;;  %s214_s30 = scalar_select %p213_p11, %s596_s15, 1 }
  0x15   : > { %460 = vmatprep.subr.mxu0 %v606_v1  ;;  %468 = vmatprep.mubr.msk.f32.mxu0 %vm607_vm1, %v606_v1  ;;  %v232_v3 = vld [vmem:[%s756_s2 + $0x8] sm:$0xff]  ;;  %v231_v4 = vld [vmem:[%s756_s2] sm:$0xff]  ;;  %vm322_vm2 = vcmask 261120   ;;  %p530_p13 = pnand %p529_p12, %p669_p4  ;;  %s608_s15 = smov [#allocation2]  }
  0x16   : > { %461 = vmatpush3.xpose.msk.msra.mxu0 %vm236_vm0, %v234_v0  ;;  %s444_s6 = sshll.u32 %s214_s30, 3 }
  0x17   : > { %462 = vmatprep.subr.mxu0 %v606_v1  ;;  %s216_s11 = scalar_lea.vmem %s754_s0, %s444_s6  ;;  %s223_s26 = scalar_lea.vmem %s755_s1, %s444_s6 }
  0x18   : > { %v230_v5 = vld [vmem:[%s216_s11] sm:$0xff]  ;;  %p531_p0 = pneg %p530_p13  ;;  %s532_s6 = sshll.u32 %s608_s15, 4  ;;  %s533_s6 = int_to_ptr.vmem [resolvable:$false] %s532_s6 }
  0x19   : > { %v235_v6 = vld [vmem:[%s223_s26] sm:$0xff]  ;;  %s534_s9 = scalar_lea.vmem %s533_s6, 256  ;;  %p535_p1 = scmp.lt.s32.totalorder %s340_s29, %s533_s6 }
  0x1a   : > { %463 = vmatpush3.xpose.msk.msra.mxu0 %vm236_vm0, %v233_v2  ;;  %p536_p2 = scmp.lt.s32.totalorder %s534_s9, %s528_s8 }
  0x1b   : > { %464 = vmatprep.subr.mxu0 %v606_v1 }
  0x1c   : > { %p537_p3 = por %p536_p2, %p535_p1 }
  0x1e   : > { %465 = vmatpush3.xpose.msk.msra.mxu0 %vm236_vm0, %v232_v3  ;;  %p538_p5 = pnand %p537_p3, %p531_p0 }
  0x1f   : > { %466 = vmatprep.subr.mxu0 %v606_v1 }
  0x22   : > { %467 = vmatpush3.xpose.msk.msra.mxu0 %vm236_vm0, %v231_v4 }
  0x25   : > { %469 = vmatmul.mubr.msk.f32.vlgmr.msra.gmra.mxu0 %vm236_vm0, %v230_v5 }
  0xe5   : > { %v318_v7 = vpop.f32.mrf.mxu0 }
  0xe6   : > { %v319_v8 = vadd.f32 %v318_v7, %v235_v6 }
  0xe7   : > { %v470_v9 = vpop.f32.mrf.mxu0 }
  0xe8   : > { %323 = vst.msk [vmem:[%s212_s28] sm:$0xff] %vm322_vm2, %v319_v8 }
  0xe9   : > { %541 = shalt.err (!%p538_p5)
}
  0xea   : > { %s542_s10 = scalar_lea.hbm %s714_s5, 128  ;;  %s546_s19 = scalar_lea.hbm %s757_s3, 256 }
  0xeb   : > { %p543_p6 = scmp.ne.s32.totalorder %s714_s5, %s542_s10  ;;  %p547_p10 = scmp.lt.s32.totalorder %s714_s5, %s757_s3 }
  0xec   : > { %p548_p11 = scmp.lt.s32.totalorder %s546_s19, %s542_s10 }
  0xed   : > { %p544_p7 = pnand %p543_p6, %p669_p4 }
  0xee   : > { %p549_p12 = por %p548_p11, %p547_p10 }
  0xef   : > { %p545_p9 = pneg %p544_p7 }
  0xf1   : > { %p550_p13 = pnand %p549_p12, %p545_p9 }
  0xf3   : > { %553 = shalt.err (!%p550_p13)
}
  0xf4   : > { %471 = dma.vmem_to_hbm [thread:$0]  (%p669_p4), %s340_s29, 128, %s714_s5, %s325_s7  }
  0xf5 PF: > { %p477_p0 = scmp.ge.s32.totalorder %s604_s17, 2  ;;  %s351_s26 = sand.u32 1, %s584_s12  }
  0xf6   : > { %s352_s27 = scalar_lea.sflag [#allocation3], %s351_s26 }
  0xf7   : > { %p474_p1 = pnand %p477_p0, %p676_p8 }
  0xf9   : > { %p475_p2 = pneg %p474_p1 }
  0xfb   : > { %579 = dma.done.wait (%p475_p2), %s352_s27, 128  }
  0xfc   : > { %581 = vsyncadd (%p475_p2), %s352_s27, 4294967168  ;;  %s16_s17 = sadd.s32 1, %s604_s17   ;;  %s760_s12 = smov %s588_s13 }
  0xfd   : > { %p13_p3 = scmp.ge.s32.totalorder %s16_s17, 4   ;;  %s761_s13 = smov %s592_s14 }
  0xfe   : > { %s762_s14 = smov %s682_s25  ;;  %s763_s15 = smov %s600_s16 }
  0xff   : > { %s764_s16 = smov %s766_s20  ;;  %15 = sbr.rel (!%p13_p3) target bundleno = 4 (0x4), region = 73 }
 0x104   :  { %357 = vsyncpa [#allocation3], 1 }
 0x105   :  { %359 = vsyncpa [#allocation3 + $0x1], 1 }

</bundles_post_ra>
